<compile_context>
chip_gen: v6e
topology: v6e:2x2x1
jax: 0.10.0
libtpu: 0.0.40
codegen_flags: <defaults>
</compile_context>

<pallas_src>
import jax
import jax.numpy as jnp
from jax.experimental import pallas as pl
from jax.experimental.pallas import tpu as pltpu


def _round_up(x, m):
    return ((x + m - 1) // m) * m


def news_encoder_kernel(t_ref, b_ref, w1_ref, b1_ref, w2_ref, b2_ref, o_ref):
    # t_ref / b_ref : (TB, G)   title / body embedding tiles (streamed)
    # w1_ref : (2G, G), b1_ref : (1, G), w2_ref : (G, D), b2_ref : (1, D)  (resident)
    # o_ref  : (TB, D)
    # The concat lives purely in lanes (never materialized in HBM); one K=2G
    # dot instead of two K=G dots -> better MXU column utilization.
    x = jnp.concatenate([t_ref[...], b_ref[...]], axis=-1)            # (TB, 2G)
    h = jnp.tanh(
        jnp.dot(x, w1_ref[...], preferred_element_type=jnp.float32)
        + b1_ref[...]
    )                                                                 # (TB, G)
    out = jnp.dot(h, w2_ref[...], preferred_element_type=jnp.float32) + b2_ref[...]
    o_ref[...] = out.astype(o_ref.dtype)                              # (TB, D)


def news_encoder_forward(title_emb, body_emb, params, tb=2048):
    """title_emb, body_emb: (N, G) f32; params: w1 (2G, G), b1 (G,), w2 (G, D), b2 (D,).

    Returns (N, D), matching the PyTorch NewsEncoder forward.
    """
    N, G = title_emb.shape
    D = params["w2"].shape[1]

    # Row tile: as large as allowed (default 2048) to amortize per-step overhead
    # and saturate HBM, a multiple of 8 sublanes, but capped at ~ceil(N/2) so
    # the grid always has >= 2 steps for v7x's two TensorCores.
    TB = max(8, min(_round_up(tb, 8), _round_up(pl.cdiv(N, 2), 8)))
    grid = (pl.cdiv(N, TB),)        # no input padding / output slicing needed

    w1 = params["w1"]               # (2G, G) unsplit -> single K=2G matmul
    b1 = params["b1"].reshape(1, G)
    w2 = params["w2"]               # (G, D)
    b2 = params["b2"].reshape(1, D)

    out = pl.pallas_call(
        news_encoder_kernel,
        out_shape=jax.ShapeDtypeStruct((N, D), title_emb.dtype),
        grid_spec=pltpu.PrefetchScalarGridSpec(
            num_scalar_prefetch=0,
            grid=grid,
            in_specs=[
                pl.BlockSpec((TB, G), lambda i: (i, 0)),      # title tile (streamed)
                pl.BlockSpec((TB, G), lambda i: (i, 0)),      # body tile (streamed)
                pl.BlockSpec((2 * G, G), lambda i: (0, 0)),   # W1 (resident)
                pl.BlockSpec((1, G), lambda i: (0, 0)),       # b1 (resident)
                pl.BlockSpec((G, D), lambda i: (0, 0)),       # W2 (resident)
                pl.BlockSpec((1, D), lambda i: (0, 0)),       # b2 (resident)
            ],
            out_specs=pl.BlockSpec((TB, D), lambda i: (i, 0)),
        ),
        compiler_params=pltpu.CompilerParams(
            dimension_semantics=("parallel",),
        ),
    )(title_emb, body_emb, w1, b1, w2, b2)

    return out


def reference_forward(title_emb, body_emb, params):
    x = jnp.concatenate([title_emb, body_emb], axis=-1)               # (N, 2G)
    h = jnp.tanh(x @ params["w1"] + params["b1"])                     # (N, G)
    return h @ params["w2"] + params["b2"]                            # (N, D)


if __name__ == "__main__":
    # Module-consistent small shapes: gpt_news_dim G=32 (concat width 64), news_dim D=32.
    G, D = 32, 32

    key = jax.random.PRNGKey(0)
    k_t1, k_b1e, k_w1, k_bb1, k_w2, k_bb2, k_t2, k_b2e = jax.random.split(key, 8)

    params = {
        "w1": 0.1 * jax.random.normal(k_w1, (2 * G, G), dtype=jnp.float32),
        "b1": 0.1 * jax.random.normal(k_bb1, (G,), dtype=jnp.float32),
        "w2": 0.1 * jax.random.normal(k_w2, (G, D), dtype=jnp.float32),
        "b2": 0.1 * jax.random.normal(k_bb2, (D,), dtype=jnp.float32),
    }

    # Case 1: tiny N=16 -> TB is capped to 8 so the grid still has 2 parallel steps.
    N1 = 16
    title1 = jax.random.normal(k_t1, (N1, G), dtype=jnp.float32)
    body1 = jax.random.normal(k_b1e, (N1, G), dtype=jnp.float32)
    out1 = news_encoder_forward(title1, body1, params)
    jax.block_until_ready(out1)
    ref1 = reference_forward(title1, body1, params)
    assert out1.shape == (N1, D)
    assert jnp.allclose(out1, ref1, atol=1e-5, rtol=1e-5), "case 1 mismatch vs reference"

    # Case 2: N not a multiple of the row tile -> exercises the pad-free cdiv
    # grid with a masked tail block (TB=64, grid=4, last block half-valid).
    N2 = 200
    title2 = jax.random.normal(k_t2, (N2, G), dtype=jnp.float32)
    body2 = jax.random.normal(k_b2e, (N2, G), dtype=jnp.float32)
    out2 = news_encoder_forward(title2, body2, params, tb=64)
    jax.block_until_ready(out2)
    ref2 = reference_forward(title2, body2, params)
    assert out2.shape == (N2, D)
    assert jnp.allclose(out2, ref2, atol=1e-5, rtol=1e-5), "case 2 mismatch vs reference"

    print("KERNEL_OK")
</pallas_src>

<mosaic_0001>
module attributes {stable_mosaic.version = 11 : i64} {
  func.func @news_encoder_kernel(%arg0: i32, %arg1: memref<8x32xf32, #tpu.memory_space<vmem>>, %arg2: memref<8x32xf32, #tpu.memory_space<vmem>>, %arg3: memref<64x32xf32, #tpu.memory_space<vmem>>, %arg4: memref<1x32xf32, #tpu.memory_space<vmem>>, %arg5: memref<32x32xf32, #tpu.memory_space<vmem>>, %arg6: memref<1x32xf32, #tpu.memory_space<vmem>>, %arg7: memref<8x32xf32, #tpu.memory_space<vmem>>) attributes {dimension_semantics = [#tpu.dimension_semantics<parallel>], iteration_bounds = array<i64: 2>, scalar_prefetch = 0 : i64, scratch_operands = 0 : i64, tpu.core_type = #tpu.core_type<tc>, window_params = [{transform_indices = @transform_0, window_bounds = array<i64: 8, 32>}, {transform_indices = @transform_1, window_bounds = array<i64: 8, 32>}, {pipeline_mode = #tpu.pipeline_mode<synchronous>, transform_indices = @transform_2, window_bounds = array<i64: 64, 32>}, {pipeline_mode = #tpu.pipeline_mode<synchronous>, transform_indices = @transform_3, window_bounds = array<i64: 1, 32>}, {pipeline_mode = #tpu.pipeline_mode<synchronous>, transform_indices = @transform_4, window_bounds = array<i64: 32, 32>}, {pipeline_mode = #tpu.pipeline_mode<synchronous>, transform_indices = @transform_5, window_bounds = array<i64: 1, 32>}, {transform_indices = @transform_6, window_bounds = array<i64: 8, 32>}]} {
    %c0 = arith.constant 0 : index
    %c0_0 = arith.constant 0 : index
    %0 = vector.load %arg1[%c0, %c0_0] : memref<8x32xf32, #tpu.memory_space<vmem>>, vector<8x32xf32>
    %c0_1 = arith.constant 0 : index
    %c0_2 = arith.constant 0 : index
    %1 = vector.load %arg2[%c0_1, %c0_2] : memref<8x32xf32, #tpu.memory_space<vmem>>, vector<8x32xf32>
    %2 = tpu.concatenate %0, %1 in 1 : vector<8x32xf32>, vector<8x32xf32> -> vector<8x64xf32>
    %c0_3 = arith.constant 0 : index
    %c0_4 = arith.constant 0 : index
    %3 = vector.load %arg3[%c0_3, %c0_4] : memref<64x32xf32, #tpu.memory_space<vmem>>, vector<64x32xf32>
    %cst = arith.constant dense<0.000000e+00> : vector<8x32xf32>
    %4 = tpu.matmul %2, %3, %cst {dimension_numbers = #tpu.dot_dimension_numbers<[1], [0], [0], [1], [0, 0, 1, 1], [], []>} : vector<8x64xf32>, vector<64x32xf32>, vector<8x32xf32> -> vector<8x32xf32>
    %c0_5 = arith.constant 0 : index
    %c0_6 = arith.constant 0 : index
    %5 = vector.load %arg4[%c0_5, %c0_6] : memref<1x32xf32, #tpu.memory_space<vmem>>, vector<1x32xf32>
    %6 = vector.broadcast %5 : vector<1x32xf32> to vector<8x32xf32>
    %7 = arith.addf %4, %6 : vector<8x32xf32>
    %8 = math.tanh %7 : vector<8x32xf32>
    %c0_7 = arith.constant 0 : index
    %c0_8 = arith.constant 0 : index
    %9 = vector.load %arg5[%c0_7, %c0_8] : memref<32x32xf32, #tpu.memory_space<vmem>>, vector<32x32xf32>
    %cst_9 = arith.constant dense<0.000000e+00> : vector<8x32xf32>
    %10 = tpu.matmul %8, %9, %cst_9 {dimension_numbers = #tpu.dot_dimension_numbers<[1], [0], [0], [1], [0, 0, 1, 1], [], []>} : vector<8x32xf32>, vector<32x32xf32>, vector<8x32xf32> -> vector<8x32xf32>
    %c0_10 = arith.constant 0 : index
    %c0_11 = arith.constant 0 : index
    %11 = vector.load %arg6[%c0_10, %c0_11] : memref<1x32xf32, #tpu.memory_space<vmem>>, vector<1x32xf32>
    %12 = vector.broadcast %11 : vector<1x32xf32> to vector<8x32xf32>
    %13 = arith.addf %10, %12 : vector<8x32xf32>
    %c0_12 = arith.constant 0 : index
    %c0_13 = arith.constant 0 : index
    %14 = vector.load %arg7[%c0_12, %c0_13] : memref<8x32xf32, #tpu.memory_space<vmem>>, vector<8x32xf32>
    tpu.vector_store %arg7[%c0_12, %c0_13], %13 {strides = array<i32>} : memref<8x32xf32, #tpu.memory_space<vmem>>, vector<8x32xf32>,
    return
  }
  func.func @transform_0(%arg0: i32) -> (i32, i32) {
    %c0_i32 = arith.constant 0 : i32
    %c0_i32_0 = arith.constant 0 : i32
    return %arg0, %c0_i32 : i32, i32
  }
  func.func @transform_1(%arg0: i32) -> (i32, i32) {
    %c0_i32 = arith.constant 0 : i32
    %c0_i32_0 = arith.constant 0 : i32
    return %arg0, %c0_i32 : i32, i32
  }
  func.func @transform_2(%arg0: i32) -> (i32, i32) {
    %c0_i32 = arith.constant 0 : i32
    %c0_i32_0 = arith.constant 0 : i32
    %c0_i32_1 = arith.constant 0 : i32
    return %c0_i32, %c0_i32_0 : i32, i32
  }
  func.func @transform_3(%arg0: i32) -> (i32, i32) {
    %c0_i32 = arith.constant 0 : i32
    %c0_i32_0 = arith.constant 0 : i32
    %c0_i32_1 = arith.constant 0 : i32
    return %c0_i32, %c0_i32_0 : i32, i32
  }
  func.func @transform_4(%arg0: i32) -> (i32, i32) {
    %c0_i32 = arith.constant 0 : i32
    %c0_i32_0 = arith.constant 0 : i32
    %c0_i32_1 = arith.constant 0 : i32
    return %c0_i32, %c0_i32_0 : i32, i32
  }
  func.func @transform_5(%arg0: i32) -> (i32, i32) {
    %c0_i32 = arith.constant 0 : i32
    %c0_i32_0 = arith.constant 0 : i32
    %c0_i32_1 = arith.constant 0 : i32
    return %c0_i32, %c0_i32_0 : i32, i32
  }
  func.func @transform_6(%arg0: i32) -> (i32, i32) {
    %c0_i32 = arith.constant 0 : i32
    %c0_i32_0 = arith.constant 0 : i32
    return %arg0, %c0_i32 : i32, i32
  }
}

</mosaic_0001>

<bundles_post_ra>
// kernel: tpu_custom_call.1
= control target key start
LH: loop header
LB: loop body
LE: loop exit
PB: predicated region body
PF: predicated region fallthrough
CT: control target
= control target key end

     0   :  { %11 = vsyncpa [#allocation3], 0  ;;  %s880_s0 = inlined_call_operand.vmem [shape: f32[16,32], index: 0, kind: input, shape index: {}]   ;;  %s881_s1 = inlined_call_operand.vmem [shape: f32[16,32], index: 1, kind: input, shape index: {}]   ;;  %s882_s2 = inlined_call_operand.vmem [shape: f32[64,32], index: 2, kind: input, shape index: {}]   ;;  %s883_s3 = inlined_call_operand.vmem [shape: f32[1,32], index: 3, kind: input, shape index: {}]   ;;  %s884_s4 = inlined_call_operand.vmem [shape: f32[32,32], index: 4, kind: input, shape index: {}]   ;;  %s885_s5 = inlined_call_operand.vmem [shape: f32[1,32], index: 5, kind: input, shape index: {}]   ;;  %s886_s6 = inlined_call_operand.hbm [shape: f32[16,32], index: 6, kind: output, shape index: {}]  }
   0x1   :  { %13 = vsyncpa [#allocation3 + $0x1], 0  ;;  %s736_s21 = smov 0   ;;  %s738_s22 = smov 0  }
   0x2   :  { %s740_s23 = smov 0   ;;  %s742_s24 = smov 0  }
   0x3 LB: > { %s757_s25 = sadd.s32 4294967295, %s695_s24   ;;  %s532_s26 = sadd.s32 4294967294, %s695_s24   ;;  %s695_s24 = sphi %s742_s24, %s892_s24   ;;  %s691_s23 = sphi %s740_s23, %s891_s23   ;;  %s687_s22 = sphi %s738_s22, %s890_s22   ;;  %s683_s21 = sphi %s736_s21, %s889_s21  }
   0x4   : > { %s761_s27 = sadd.s32 1, %s695_s24   ;;  %s162_s28 = sadd.s32 1, %s691_s23 }
   0x5   : > { %s159_s29 = ssub.s32 %s695_s24, %s761_s27  ;;  %p172_p0 = scmp.ne.s32.totalorder %s691_s23, %s687_s22 }
   0x6   : > { %p160_p1 = scmp.eq.s32.totalorder %s159_s29, 0  ;;  %p173_p2 = scmp.eq.s32.totalorder %s757_s25, 1 }
   0x7   : > { %p178_p3 = scmp.ne.s32.totalorder %s687_s22, %s683_s21  ;;  %p179_p4 = scmp.eq.s32.totalorder %s532_s26, 1 }
   0x8   : > { %s772_s30 = scalar_select %p160_p1, %s691_s23, %s162_s28  }
   0x9   : > { %p774_p5 = por %p173_p2, %p172_p0  ;;  %p778_p6 = por %p179_p4, %p178_p3 }
   0xa   : > { %p535_p7 = scmp.ge.s32.totalorder %s695_s24, 1  ;;  %p223_p8 = scmp.lt.s32.totalorder %s695_s24, 3 }
   0xc   : > { %p224_p9 = pnand %p535_p7, %p223_p8 }
   0xd   : > { %p256_p10 = scmp.lt.s32.totalorder (!%p224_p9), %s757_s25, 1  ;;  %s699_s28 = smov (!%p224_p9), 32  }
   0xe   : > { %227 = sbr.rel (%p224_p9) target bundleno = 557 (0x22d), region = 44  ;;  %s253_s14 = sand.u32 (!%p224_p9), 1, %s687_s22  }
   0xf   : > { %s536_s15 = sshll.u32 (!%p224_p9), %s253_s14, 3 }
  0x10   : > { %s255_s20 = scalar_lea.vmem (!%p224_p9), [#allocation2], %s536_s15 }
  0x11   : > { %s461_s26 = sshll.u32 (!%p224_p9), %s255_s20, 4  ;;  %s462_s26 = int_to_ptr.vmem [resolvable:$true] %s461_s26 }
  0x12   : > { %s635_s10 = scalar_lea.vmem (!%p224_p9), %s462_s26, 128 }
  0x13   : > { %v279_v0 = vld [vmem:[%s882_s2 + $0x38] sm:$0xff]  ;;  %v697_v1 = vmov 0.0   ;;  %v278_v2 = vld [vmem:[%s882_s2 + $0x30] sm:$0xff]  ;;  %s792_s13 = scalar_select %p256_p10, %s757_s25, 1  ;;  %vm698_vm0 = vmmov 0   ;;  %v277_v3 = vld [vmem:[%s882_s2 + $0x28] sm:$0xff] }
  0x14   : > { %561 = vmatprep.subr.mxu0 %v697_v1  ;;  %580 = vmatprep.subr.mxu1 %v697_v1  ;;  %v276_v4 = vld [vmem:[%s882_s2 + $0x20] sm:$0xff]  ;;  %v275_v6 = vld [vmem:[%s882_s2 + $0x18] sm:$0xff]  ;;  %v274_v7 = vld [vmem:[%s882_s2 + $0x10] sm:$0xff]  ;;  %vm270_vm1 = vcmask 261120   ;;  %vm287_vm2 = vcmask 523264   ;;  %p636_p11 = scmp.ne.s32.totalorder %s462_s26, %s635_s10 }
  0x15   : > { %562 = vmatpush3.msra.mxu0 %v279_v0  ;;  %577 = vmatprep.mubr.msk.f32.mxu0 %vm698_vm0, %v697_v1  ;;  %s537_s16 = sshll.u32 %s792_s13, 3  ;;  %v273_v8 = vld [vmem:[%s882_s2 + $0x8] sm:$0xff]  ;;  %v272_v9 = vld [vmem:[%s882_s2] sm:$0xff]  ;;  %v365_v13 = vld [vmem:[%s884_s4 + $0x18] sm:$0xff] }
  0x16   : > { %563 = vmatprep.subr.mxu0 %v697_v1  ;;  %588 = vmatprep.mubr.msk.f32.mxu1 %vm698_vm0, %v697_v1  ;;  %s263_s19 = scalar_lea.vmem %s881_s1, %s537_s16  ;;  %v364_v14 = vld [vmem:[%s884_s4 + $0x10] sm:$0xff]  ;;  %v363_v15 = vld [vmem:[%s884_s4 + $0x8] sm:$0xff]  ;;  %v362_v16 = vld [vmem:[%s884_s4] sm:$0xff]  ;;  %p637_p12 = pnand %p636_p11, %p774_p5 }
  0x17   : > { %564 = vmatpush3.msra.mxu0 %v278_v2  ;;  %v265_v5 = vld [vmem:[%s263_s19] sm:$0xff]  ;;  %s259_s19 = scalar_lea.vmem %s880_s0, %s537_s16  ;;  %581 = vmatpush3.msra.mxu1 %v365_v13  ;;  %s448_s16 = scalar_lea.sflag [#allocation3], %s253_s14 }
  0x18   : > { %565 = vmatprep.subr.mxu0 %v697_v1  ;;  %267 = vrot.lane.b32.xlu0 %v265_v5, %s699_s28  ;;  %v264_v10 = vld [vmem:[%s259_s19] sm:$0xff]  ;;  %s544_s19 = sshll.u32 %s757_s25, 7  ;;  %p638_p13 = pneg %p637_p12 }
  0x19   : > { %566 = vmatpush3.msra.mxu0 %v277_v3  ;;  %582 = vmatprep.subr.mxu1 %v697_v1  ;;  %v539_v17 = vld [vmem:[%s883_s3] ss:$0 sm:$0xff]  ;;  %s844_s9 = scalar_lea.hbm %s886_s6, %s544_s19  ;;  %s700_s25 = smov [#allocation2]  }
  0x1a   : > { %567 = vmatprep.subr.mxu0 %v697_v1  ;;  %583 = vmatpush3.msra.mxu1 %v364_v14  ;;  %v541_v22 = vld [vmem:[%s885_s5] ss:$0 sm:$0xff]  ;;  %s639_s11 = sshll.u32 %s700_s25, 4  ;;  %s640_s11 = int_to_ptr.vmem [resolvable:$false] %s639_s11 }
  0x1b   : > { %568 = vmatpush3.msra.mxu0 %v276_v4  ;;  %584 = vmatprep.subr.mxu1 %v697_v1  ;;  %s641_s12 = scalar_lea.vmem %s640_s11, 256  ;;  %p642_p0 = scmp.lt.s32.totalorder %s462_s26, %s640_s11 }
  0x1c   : > { %569 = vmatprep.subr.mxu0 %v697_v1  ;;  %585 = vmatpush3.msra.mxu1 %v363_v15  ;;  %p643_p1 = scmp.lt.s32.totalorder %s641_s12, %s635_s10 }
  0x1d   : > { %570 = vmatpush3.msra.mxu0 %v275_v6  ;;  %586 = vmatprep.subr.mxu1 %v697_v1 }
  0x1e   : > { %571 = vmatprep.subr.mxu0 %v697_v1  ;;  %587 = vmatpush3.msra.mxu1 %v362_v16  ;;  %p644_p2 = por %p643_p1, %p642_p0 }
  0x1f   : > { %572 = vmatpush3.msra.mxu0 %v274_v7 }
  0x20   : > { %573 = vmatprep.subr.mxu0 %v697_v1  ;;  %p645_p3 = pnand %p644_p2, %p638_p13 }
  0x21   : > { %574 = vmatpush3.msra.mxu0 %v273_v8 }
  0x22   : > { %575 = vmatprep.subr.mxu0 %v697_v1 }
  0x23   : > { %576 = vmatpush3.msra.mxu0 %v272_v9 }
  0x8a   : > { %v268_v11 = vpop.permute.xlu0 %267 }
  0x8b   : > { %v271_v12 = vsel %vm270_vm1, %v264_v10, %v268_v11 }
  0x8c   : > { %578 = vmatmul.mubr.msk.f32.vlgmr.msra.gmra.mxu0 %vm287_vm2, %v271_v12 }
 0x14c   : > { %v357_v18 = vpop.f32.mrf.mxu0 }
 0x14d   : > { %v358_v19 = vadd.f32 %v539_v17, %v357_v18 }
 0x14e   : > { %v579_v20 = vpop.f32.mrf.mxu0 }
 0x14f   : > { %633 = vtanh.f32 %v358_v19 }
 0x15c   : > { %v634_v21 = vpop.eup %633 }
 0x15d   : > { %589 = vmatmul.mubr.msk.f32.vlgmr.msra.gmra.mxu1 %vm270_vm1, %v634_v21 }
 0x21d   : > { %v442_v23 = vpop.f32.mrf.mxu1 }
 0x21e   : > { %v443_v24 = vadd.f32 %v541_v22, %v442_v23 }
 0x21f   : > { %v590_v25 = vpop.f32.mrf.mxu1 }
 0x220   : > { %446 = vst.msk [vmem:[%s255_s20] sm:$0xff] %vm270_vm1, %v443_v24 }
 0x221   : > { %648 = shalt.err (!%p645_p3)
}
 0x222   : > { %s649_s13 = scalar_lea.hbm %s844_s9, 128  ;;  %s653_s17 = scalar_lea.hbm %s886_s6, 256 }
 0x223   : > { %p650_p4 = scmp.ne.s32.totalorder %s844_s9, %s649_s13  ;;  %p654_p9 = scmp.lt.s32.totalorder %s844_s9, %s886_s6 }
 0x224   : > { %p655_p10 = scmp.lt.s32.totalorder %s653_s17, %s649_s13 }
 0x225   : > { %p651_p7 = pnand %p650_p4, %p774_p5 }
 0x226   : > { %p656_p11 = por %p655_p10, %p654_p9 }
 0x227   : > { %p652_p8 = pneg %p651_p7 }
 0x229   : > { %p657_p12 = pnand %p656_p11, %p652_p8 }
 0x22b   : > { %660 = shalt.err (!%p657_p12)
}
 0x22c   : > { %591 = dma.vmem_to_hbm [thread:$0]  (%p774_p5), %s462_s26, 128, %s844_s9, %s448_s16  }
 0x22d PF: > { %p597_p13 = scmp.ge.s32.totalorder %s695_s24, 2  ;;  %s473_s20 = sand.u32 1, %s683_s21  }
 0x22e   : > { %s474_s28 = scalar_lea.sflag [#allocation3], %s473_s20 }
 0x22f   : > { %p594_p0 = pnand %p597_p13, %p778_p6 }
 0x231   : > { %p595_p1 = pneg %p594_p0 }
 0x233   : > { %678 = dma.done.wait (%p595_p1), %s474_s28, 128  }
 0x234   : > { %680 = vsyncadd (%p595_p1), %s474_s28, 4294967168  ;;  %p16_p2 = scmp.ge.s32.totalorder %s761_s27, 4   ;;  %s889_s21 = smov %s687_s22 }
 0x235   : > { %s890_s22 = smov %s691_s23  ;;  %s891_s23 = smov %s772_s30 }
 0x236   : > { %s892_s24 = smov %s761_s27  ;;  %18 = sbr.rel (!%p16_p2) target bundleno = 3 (0x3), region = 82 }
 0x23b   :  { %479 = vsyncpa [#allocation3], 1 }
 0x23c   :  { %481 = vsyncpa [#allocation3 + $0x1], 1 }

</bundles_post_ra>
